<compile_context>
chip_gen: v7x
topology: tpu7x:2x2x1
jax: 0.10.0
libtpu: 0.0.40
codegen_flags: <defaults>
</compile_context>

<pallas_src>
import functools

import jax
import jax.numpy as jnp
from jax import lax
from jax.experimental import pallas as pl
from jax.experimental.pallas import tpu as pltpu


def _round_up(x, m):
    return (x + m - 1) // m * m


def _pairwise_ranking_kernel(im_ref, s_ref, drow_ref, dcol_ref, o_ref, *,
                             margin, n_valid, tb, mask_bounds):
    i = pl.program_id(0)      # row block of scores
    j = pl.program_id(1)      # col block of scores (reduction axis)

    @pl.when(j == 0)
    def _init():
        o_ref[...] = jnp.zeros_like(o_ref)

    # Scores tile on the MXU: pre-normalized bf16 inputs, f32 accumulate,
    # contract dim 1 directly (no materialized transpose of the RHS).
    scores = lax.dot_general(
        im_ref[...], s_ref[...],
        dimension_numbers=(((1,), (1,)), ((), ())),
        preferred_element_type=jnp.float32)            # (tb, tb) f32

    d_row = drow_ref[...]                              # (1, tb)  f32, d[j]
    d_col = dcol_ref[...]                              # (tb, 1)  f32, d[i]

    cost = (jnp.maximum(0.0, (margin - d_row) + scores) +
            jnp.maximum(0.0, (margin - d_col) + scores))

    # Masking is only needed on diagonal tiles (zero cost[k,k]) and, when N was
    # padded, on the boundary tiles that contain padded rows / cols.
    needs_mask = i == j
    if mask_bounds:
        last_i = pl.num_programs(0) - 1
        last_j = pl.num_programs(1) - 1
        needs_mask = jnp.logical_or(
            needs_mask, jnp.logical_or(i == last_i, j == last_j))

    @pl.when(needs_mask)
    def _masked():
        row_ids = i * tb + lax.broadcasted_iota(jnp.int32, (tb, tb), 0)
        col_ids = j * tb + lax.broadcasted_iota(jnp.int32, (tb, tb), 1)
        keep = row_ids != col_ids
        if mask_bounds:
            keep = jnp.logical_and(
                keep,
                jnp.logical_and(row_ids < n_valid, col_ids < n_valid))
        o_ref[...] += jnp.where(keep, cost, 0.0)

    @pl.when(jnp.logical_not(needs_mask))
    def _plain():
        o_ref[...] += cost


def pairwise_ranking_loss(im, s, margin=1.0, block_n=None):
    """im, s: (N, D) float arrays. Returns scalar float32 loss."""
    assert im.shape == s.shape and im.ndim == 2
    n, d = im.shape

    # ---- wrapper-side (plain JAX, done once): normalize + exact diagonal ----
    imf = im.astype(jnp.float32)
    sf = s.astype(jnp.float32)
    # Note: reference divides by the raw L2 norm (no eps); an all-zero row
    # produces inf/NaN in both implementations.
    im_n = imf * lax.rsqrt(jnp.sum(imf * imf, axis=1, keepdims=True))
    s_n = sf * lax.rsqrt(jnp.sum(sf * sf, axis=1, keepdims=True))
    diag = jnp.sum(im_n * s_n, axis=1)                  # (N,) exact f32 d[k]

    # ---- tile sizes: 128-aligned (or full) blocks only ----
    if block_n is not None:
        tb = int(block_n)
        assert tb % 128 == 0 or tb >= n, \
            "block_n must be a multiple of 128 (or >= N)"
    elif n <= 128:
        tb = _round_up(n, 8)
    else:
        tb = 128
    n_pad = _round_up(n, tb)
    d_pad = _round_up(d, 128)
    nb = n_pad // tb
    mask_bounds = n_pad != n      # zero-padded D columns are exact, no mask

    im_b = jnp.pad(im_n.astype(jnp.bfloat16), ((0, n_pad - n), (0, d_pad - d)))
    s_b = jnp.pad(s_n.astype(jnp.bfloat16), ((0, n_pad - n), (0, d_pad - d)))
    diag_p = jnp.pad(diag, (0, n_pad - n))
    d_row = diag_p.reshape(1, n_pad)                    # sliced by j
    d_col = diag_p.reshape(n_pad, 1)                    # sliced by i

    kernel = functools.partial(_pairwise_ranking_kernel,
                               margin=float(margin), n_valid=n, tb=tb,
                               mask_bounds=mask_bounds)

    out = pl.pallas_call(
        kernel,
        out_shape=jax.ShapeDtypeStruct((n_pad, tb), jnp.float32),
        grid_spec=pltpu.PrefetchScalarGridSpec(
            num_scalar_prefetch=0,
            grid=(nb, nb),
            in_specs=[
                pl.BlockSpec((tb, d_pad), lambda i, j: (i, 0)),   # im rows
                pl.BlockSpec((tb, d_pad), lambda i, j: (j, 0)),   # s  cols
                pl.BlockSpec((1, tb), lambda i, j: (0, j)),       # d[j]
                pl.BlockSpec((tb, 1), lambda i, j: (i, 0)),       # d[i]
            ],
            out_specs=pl.BlockSpec((tb, tb), lambda i, j: (i, 0)),
        ),
        compiler_params=pltpu.CompilerParams(
            # i: independent row blocks (megacore on v7x); j: reduction.
            dimension_semantics=("parallel", "arbitrary")),
    )(im_b, s_b, d_row, d_col)

    # Final reduction + normalization on the per-row-block partials.
    return jnp.sum(out) / n


def _reference_loss(im, s, margin=1.0):
    im_n = im / jnp.linalg.norm(im, axis=1, keepdims=True)
    s_n = s / jnp.linalg.norm(s, axis=1, keepdims=True)
    scores = im_n @ s_n.T
    diag = jnp.diag(scores)
    cost_s = jnp.maximum(0.0, margin - diag[None, :] + scores)
    cost_im = jnp.maximum(0.0, margin - diag[:, None] + scores)
    n = scores.shape[0]
    mask = 1.0 - jnp.eye(n, dtype=scores.dtype)
    return (jnp.sum(cost_s * mask) + jnp.sum(cost_im * mask)) / n


if __name__ == "__main__":
    key = jax.random.PRNGKey(0)
    k1, k2, k3, k4 = jax.random.split(key, 4)

    # Case 1: shapes implied by the module — a batch of N embeddings of dim D.
    N, D = 8, 32
    im = jax.random.normal(k1, (N, D), dtype=jnp.float32)
    s = jax.random.normal(k2, (N, D), dtype=jnp.float32)
    loss = pairwise_ranking_loss(im, s, margin=1.0)
    jax.block_until_ready(loss)
    ref = _reference_loss(im, s, margin=1.0)
    assert jnp.allclose(loss, ref, rtol=2e-2, atol=2e-2), (loss, ref)

    # Case 2: multi-block grid with N- and D-padding + boundary masking
    # (N=200 -> tb=128, n_pad=256, grid (2,2); D=96 -> d_pad=128).
    N2, D2 = 200, 96
    im2 = jax.random.normal(k3, (N2, D2), dtype=jnp.float32)
    s2 = jax.random.normal(k4, (N2, D2), dtype=jnp.float32)
    loss2 = pairwise_ranking_loss(im2, s2, margin=1.0)
    jax.block_until_ready(loss2)
    ref2 = _reference_loss(im2, s2, margin=1.0)
    assert jnp.allclose(loss2, ref2, rtol=2e-2, atol=2e-2), (loss2, ref2)

    print("KERNEL_OK")
</pallas_src>

<mosaic_0001>
module attributes {stable_mosaic.version = 11 : i64} {
  func.func @_pairwise_ranking_kernel(%arg0: i32, %arg1: i32, %arg2: memref<8x128xbf16, #tpu.memory_space<vmem>>, %arg3: memref<8x128xbf16, #tpu.memory_space<vmem>>, %arg4: memref<1x8xf32, #tpu.memory_space<vmem>>, %arg5: memref<8x1xf32, #tpu.memory_space<vmem>>, %arg6: memref<8x8xf32, #tpu.memory_space<vmem>>) attributes {dimension_semantics = [#tpu.dimension_semantics<parallel>, #tpu.dimension_semantics<arbitrary>], iteration_bounds = array<i64: 1, 1>, scalar_prefetch = 0 : i64, scratch_operands = 0 : i64, tpu.core_type = #tpu.core_type<tc>, window_params = [{transform_indices = @transform_0, window_bounds = array<i64: 8, 128>}, {transform_indices = @transform_1, window_bounds = array<i64: 8, 128>}, {transform_indices = @transform_2, window_bounds = array<i64: 1, 8>}, {transform_indices = @transform_3, window_bounds = array<i64: 8, 1>}, {transform_indices = @transform_4, window_bounds = array<i64: 8, 8>}]} {
    %c0_i32 = arith.constant 0 : i32
    %0 = arith.cmpi eq, %arg1, %c0_i32 : i32
    %1 = arith.extui %0 : i1 to i32
    %c0_i32_0 = arith.constant 0 : i32
    %2 = arith.cmpi ne, %1, %c0_i32_0 : i32
    scf.if %2 {
      %cst_14 = arith.constant 0.000000e+00 : f32
      %27 = vector.broadcast %cst_14 : f32 to vector<8x8xf32>
      %c0_15 = arith.constant 0 : index
      %c0_16 = arith.constant 0 : index
      %28 = vector.load %arg6[%c0_15, %c0_16] : memref<8x8xf32, #tpu.memory_space<vmem>>, vector<8x8xf32>
      tpu.vector_store %arg6[%c0_15, %c0_16], %27 {strides = array<i32>} : memref<8x8xf32, #tpu.memory_space<vmem>>, vector<8x8xf32>,
    } else {
    }
    %c0 = arith.constant 0 : index
    %c0_1 = arith.constant 0 : index
    %3 = vector.load %arg2[%c0, %c0_1] : memref<8x128xbf16, #tpu.memory_space<vmem>>, vector<8x128xbf16>
    %c0_2 = arith.constant 0 : index
    %c0_3 = arith.constant 0 : index
    %4 = vector.load %arg3[%c0_2, %c0_3] : memref<8x128xbf16, #tpu.memory_space<vmem>>, vector<8x128xbf16>
    %cst = arith.constant dense<0.000000e+00> : vector<8x8xf32>
    %5 = tpu.matmul %3, %4, %cst {dimension_numbers = #tpu.dot_dimension_numbers<[1], [1], [0], [0], [0, 0, 1, 0], [], []>} : vector<8x128xbf16>, vector<8x128xbf16>, vector<8x8xf32> -> vector<8x8xf32>
    %c0_4 = arith.constant 0 : index
    %c0_5 = arith.constant 0 : index
    %6 = vector.load %arg4[%c0_4, %c0_5] : memref<1x8xf32, #tpu.memory_space<vmem>>, vector<1x8xf32>
    %c0_6 = arith.constant 0 : index
    %c0_7 = arith.constant 0 : index
    %7 = vector.load %arg5[%c0_6, %c0_7] : memref<8x1xf32, #tpu.memory_space<vmem>>, vector<8x1xf32>
    %cst_8 = arith.constant 1.000000e+00 : f32
    %8 = vector.broadcast %cst_8 : f32 to vector<1x8xf32>
    %9 = arith.subf %8, %6 : vector<1x8xf32>
    %10 = vector.broadcast %9 : vector<1x8xf32> to vector<8x8xf32>
    %11 = arith.addf %10, %5 : vector<8x8xf32>
    %cst_9 = arith.constant 0.000000e+00 : f32
    %12 = vector.broadcast %cst_9 : f32 to vector<8x8xf32>
    %13 = arith.maximumf %12, %11 : vector<8x8xf32>
    %cst_10 = arith.constant 1.000000e+00 : f32
    %14 = vector.broadcast %cst_10 : f32 to vector<8x1xf32>
    %15 = arith.subf %14, %7 : vector<8x1xf32>
    %16 = vector.broadcast %15 : vector<8x1xf32> to vector<8x8xf32>
    %17 = arith.addf %16, %5 : vector<8x8xf32>
    %cst_11 = arith.constant 0.000000e+00 : f32
    %18 = vector.broadcast %cst_11 : f32 to vector<8x8xf32>
    %19 = arith.maximumf %18, %17 : vector<8x8xf32>
    %20 = arith.addf %13, %19 : vector<8x8xf32>
    %21 = arith.cmpi eq, %arg0, %arg1 : i32
    %22 = arith.extui %21 : i1 to i32
    %c0_i32_12 = arith.constant 0 : i32
    %23 = arith.cmpi ne, %22, %c0_i32_12 : i32
    scf.if %23 {
      %c8_i32 = arith.constant 8 : i32
      %27 = arith.muli %arg0, %c8_i32 : i32
      %28 = tpu.iota {dimensions = array<i32: 0>} : vector<8x8xi32>
      %29 = vector.broadcast %27 : i32 to vector<8x8xi32>
      %30 = arith.addi %29, %28 : vector<8x8xi32>
      %c8_i32_14 = arith.constant 8 : i32
      %31 = arith.muli %arg1, %c8_i32_14 : i32
      %32 = tpu.iota {dimensions = array<i32: 1>} : vector<8x8xi32>
      %33 = vector.broadcast %31 : i32 to vector<8x8xi32>
      %34 = arith.addi %33, %32 : vector<8x8xi32>
      %35 = arith.cmpi ne, %30, %34 : vector<8x8xi32>
      %c0_15 = arith.constant 0 : index
      %c0_16 = arith.constant 0 : index
      %36 = vector.load %arg6[%c0_15, %c0_16] : memref<8x8xf32, #tpu.memory_space<vmem>>, vector<8x8xf32>
      %cst_17 = arith.constant 0.000000e+00 : f32
      %37 = vector.broadcast %cst_17 : f32 to vector<8x8xf32>
      %38 = arith.select %35, %20, %37 : vector<8x8xi1>, vector<8x8xf32>
      %39 = arith.addf %36, %38 : vector<8x8xf32>
      %c0_18 = arith.constant 0 : index
      %c0_19 = arith.constant 0 : index
      %40 = vector.load %arg6[%c0_18, %c0_19] : memref<8x8xf32, #tpu.memory_space<vmem>>, vector<8x8xf32>
      tpu.vector_store %arg6[%c0_18, %c0_19], %39 {strides = array<i32>} : memref<8x8xf32, #tpu.memory_space<vmem>>, vector<8x8xf32>,
    } else {
    }
    %true = arith.constant true
    %24 = arith.xori %21, %true : i1
    %25 = arith.extui %24 : i1 to i32
    %c0_i32_13 = arith.constant 0 : i32
    %26 = arith.cmpi ne, %25, %c0_i32_13 : i32
    scf.if %26 {
      %c0_14 = arith.constant 0 : index
      %c0_15 = arith.constant 0 : index
      %27 = vector.load %arg6[%c0_14, %c0_15] : memref<8x8xf32, #tpu.memory_space<vmem>>, vector<8x8xf32>
      %28 = arith.addf %27, %20 : vector<8x8xf32>
      %c0_16 = arith.constant 0 : index
      %c0_17 = arith.constant 0 : index
      %29 = vector.load %arg6[%c0_16, %c0_17] : memref<8x8xf32, #tpu.memory_space<vmem>>, vector<8x8xf32>
      tpu.vector_store %arg6[%c0_16, %c0_17], %28 {strides = array<i32>} : memref<8x8xf32, #tpu.memory_space<vmem>>, vector<8x8xf32>,
    } else {
    }
    return
  }
  func.func @transform_0(%arg0: i32, %arg1: i32) -> (i32, i32) {
    %c0_i32 = arith.constant 0 : i32
    %c0_i32_0 = arith.constant 0 : i32
    return %arg0, %c0_i32 : i32, i32
  }
  func.func @transform_1(%arg0: i32, %arg1: i32) -> (i32, i32) {
    %c0_i32 = arith.constant 0 : i32
    %c0_i32_0 = arith.constant 0 : i32
    return %arg1, %c0_i32 : i32, i32
  }
  func.func @transform_2(%arg0: i32, %arg1: i32) -> (i32, i32) {
    %c0_i32 = arith.constant 0 : i32
    %c0_i32_0 = arith.constant 0 : i32
    return %c0_i32, %arg1 : i32, i32
  }
  func.func @transform_3(%arg0: i32, %arg1: i32) -> (i32, i32) {
    %c0_i32 = arith.constant 0 : i32
    %c0_i32_0 = arith.constant 0 : i32
    return %arg0, %c0_i32 : i32, i32
  }
  func.func @transform_4(%arg0: i32, %arg1: i32) -> (i32, i32) {
    %c0_i32 = arith.constant 0 : i32
    %c0_i32_0 = arith.constant 0 : i32
    return %arg0, %c0_i32 : i32, i32
  }
}

</mosaic_0001>

<bundles_post_ra>
// kernel: tpu_custom_call.1
= control target key start
LH: loop header
LB: loop body
LE: loop exit
PB: predicated region body
PF: predicated region fallthrough
CT: control target
= control target key end

     0   :  { %vm23_vm0 = vcmask 64512   ;;  %v166_v1 = vmov 0.0   ;;  %vm167_vm1 = vmmov 0   ;;  %s221_s0 = inlined_call_operand.vmem [shape: bf16[8,128], index: 0, kind: input, shape index: {}]   ;;  %s222_s1 = inlined_call_operand.vmem [shape: bf16[8,128], index: 1, kind: input, shape index: {}]   ;;  %s223_s2 = inlined_call_operand.vmem [shape: f32[1,8], index: 2, kind: input, shape index: {}]   ;;  %s224_s3 = inlined_call_operand.vmem [shape: f32[8,1], index: 3, kind: input, shape index: {}]   ;;  %s225_s4 = inlined_call_operand.hbm [shape: f32[8,8], index: 4, kind: output, shape index: {}]  }
   0x1   :  { %v26_v0 = vld [vmem:[%s222_s1] sm:$0xf]  ;;  %24 = vst.msk [vmem:[#allocation2] sm:$0xff] %vm23_vm0, %v166_v1  ;;  %131 = vmatprep.subr.bf16.mxu0 %v166_v1  ;;  %133 = vmatprep.mubr.msk.bf16.mxu0 %vm167_vm1, %v166_v1 }
   0x2   :  { %v68_v2 = vld [vmem:[%s224_s3] sm:$0xff] }
   0x3   :  { %9 = vsyncpa [#allocation3], 0  ;;  %132 = vmatpush3.bf16.xpose.msra.mxu0 %v26_v0  ;;  %v168_v3 = vmov 0   ;;  %v78_v4 = vsub.f32 1.0, %v68_v2  ;;  %v25_v5 = vld [vmem:[%s221_s0] sm:$0xf]  ;;  %v71_v6 = vlaneseq }
   0x4   :  { %141 = vset.pattern.permute.xlu0 %v168_v3  ;;  %v67_v8 = vld [vmem:[%s223_s2] sm:$0x1]  ;;  %s169_s0 = smov [#allocation2]  }
   0x5   :  { %81 = vperm.xlu0 %141, %v78_v4   ;;  %v72_v7 = vshrl.u32 %v71_v6, 7  ;;  %v69_v9 = vsub.f32 1.0, %v67_v8  ;;  %v98_v14 = vand.u32 127, %v71_v6  ;;  %s121_s3 = sshll.u32 %s169_s0, 4  ;;  %s122_s3 = int_to_ptr.vmem [resolvable:$true] %s121_s3 }
   0x6   :  { %s142_s2 = scalar_lea.vmem %s122_s3, 128  ;;  %p147_p1 = scmp.lt.s32.totalorder %s122_s3, %s122_s3 }
   0x7   :  { %v73_v10 = vsub.s32 0, %v72_v7  ;;  %vm101_vm2 = vcmp.ne.s32.totalorder %v72_v7, %v98_v14  ;;  %p143_p0 = scmp.ne.s32.totalorder %s122_s3, %s142_s2  ;;  %p148_p2 = scmp.lt.s32.totalorder %s142_s2, %s142_s2 }
   0x8   :  { %v102_v23 = vld [vmem:[#allocation2] sm:$0xff] }
   0x9   :  { %v74_v11 = vrot.slane %v69_v9, %v73_v10  ;;  %p149_p3 = por %p148_p2, %p147_p1 }
   0xa   :  { %134 = vmatmul.mubr.bf16.vlgmr.msra.gmra.mrb[0].mxu0 %v25_v5 }
   0xb   :  { %p150_p4 = pnand %p149_p3, %p143_p0 }
  0x84   :  { %v82_v12 = vpop.permute.xlu0 %81 }
  0xdd   :  { %v61_v13 = vpop.f32.mrb[0].mxu0 }
  0xde   :  { %v76_v15 = vadd.f32 %v74_v11, %v61_v13  ;;  %v84_v16 = vadd.f32 %v82_v12, %v61_v13  ;;  %v135_v17 = vpop.f32.mrb[1].mxu0 }
  0xdf   :  { %v64_v18 = vpop.f32.mrb[2].mxu0 }
  0xe0   :  { %v77_v19 = vmax.f32 %v76_v15, 0.0  ;;  %v85_v20 = vmax.f32 %v84_v16, 0.0  ;;  %v136_v21 = vpop.f32.mrb[3].mxu0 }
  0xe2   :  { %v86_v22 = vadd.f32 %v85_v20, %v77_v19 }
  0xe4   :  { %v103_v24 = vsel %vm101_vm2, %v86_v22, 0.0 }
  0xe5   :  { %v104_v25 = vadd.f32 %v103_v24, %v102_v23 }
  0xe7   :  { %106 = vst.msk [vmem:[#allocation2] sm:$0xff] %vm23_vm0, %v104_v25 }
  0xe8   :  { %153 = shalt.err (!%p150_p4)
}
  0xe9   :  { %s154_s24 = scalar_lea.hbm %s225_s4, 128 }
  0xea   :  { %p155_p5 = scmp.ne.s32.totalorder %s225_s4, %s154_s24  ;;  %p158_p6 = scmp.lt.u32.totalorder %s154_s24, %s225_s4 }
  0xec   :  { %p160_p7 = pnand %p158_p6, %p155_p5 }
  0xee   :  { %163 = shalt.err (!%p160_p7)
}
  0xef   :  { %124 = dma.vmem_to_hbm [thread:$0]  %s122_s3, 128, %s225_s4, [#allocation3]  }
  0xf0   :  { %164 = dma.done.wait [#allocation3], 128  }
  0xf1   :  { %165 = vsyncadd [#allocation3], 4294967168 }
  0xf2   :  { %128 = vsyncpa [#allocation3], 1 }

</bundles_post_ra>
